<compile_context>
chip_gen: v7x
topology: tpu7x:2x2x1
jax: 0.10.0
libtpu: 0.0.40
codegen_flags: <defaults>
</compile_context>

<pallas_src>
import functools

import jax
import jax.numpy as jnp
from jax.experimental import pallas as pl
from jax.experimental.pallas import tpu as pltpu


def _round_up(x, m):
    return ((x + m - 1) // m) * m


def _mlp_fused_kernel(*refs, nlayers):
    # refs layout: x_ref, (w1, b1), (w2, b2), ..., (wn, bn), o_ref
    #   x_ref: (tm, ninput)  compute dtype (bf16)
    #   w_l  : (K_l, N_l)    compute dtype (bf16)
    #   b_l  : (1, N_l)      f32
    #   o_ref: (tm, noutput) f32
    x_ref = refs[0]
    o_ref = refs[-1]

    h = x_ref[...]
    for l in range(nlayers):
        w_ref = refs[1 + 2 * l]
        b_ref = refs[2 + 2 * l]
        acc = jnp.dot(h, w_ref[...], preferred_element_type=jnp.float32)
        acc = acc + b_ref[...]
        if l < nlayers - 1:
            acc = jnp.maximum(acc, 0.0)
            h = acc.astype(w_ref.dtype)       # back to bf16 for the next MXU pass
        else:
            o_ref[...] = acc.astype(o_ref.dtype)


def mlp_forward(x, params, ninput, noutput, *, tm=256,
                compute_dtype=jnp.bfloat16):
    """Replicates MLP.forward with one fused Pallas kernel.

    params: list of (w, b) with w stored as (in_features, out_features)
            (transpose of PyTorch's Linear weight) and b as (out_features,).
    """
    s = list(x.shape)
    s[-1] = noutput

    h2d = x.reshape(-1, ninput)
    M = h2d.shape[0]

    # Row tile: big enough to amortize grid-step overhead, never bigger than
    # the (sublane-rounded) row count.  Last block may be ragged (pl.cdiv).
    tm_eff = min(tm, _round_up(M, 8))
    grid = (pl.cdiv(M, tm_eff),)

    nlayers = len(params)

    flat_args = [h2d.astype(compute_dtype)]
    in_specs = [pl.BlockSpec((tm_eff, ninput), lambda i: (i, 0))]
    for (w, b) in params:
        K, N = w.shape
        flat_args.append(w.astype(compute_dtype))
        in_specs.append(pl.BlockSpec((K, N), lambda i: (0, 0)))     # resident weight
        flat_args.append(b.reshape(1, N).astype(jnp.float32))
        in_specs.append(pl.BlockSpec((1, N), lambda i: (0, 0)))     # resident bias

    kernel = functools.partial(_mlp_fused_kernel, nlayers=nlayers)

    out = pl.pallas_call(
        kernel,
        out_shape=jax.ShapeDtypeStruct((M, noutput), jnp.float32),
        grid_spec=pltpu.PrefetchScalarGridSpec(
            num_scalar_prefetch=0,
            grid=grid,
            in_specs=in_specs,
            out_specs=pl.BlockSpec((tm_eff, noutput), lambda i: (i, 0)),
        ),
        compiler_params=pltpu.CompilerParams(
            dimension_semantics=("parallel",)),   # v7x: shard row tiles over 2 TCs
    )(*flat_args)

    return out.reshape(*s)


def init_mlp_params(key, ninput, nh, noutput, nlayers):
    """Deterministic parameter init matching the PyTorch module's layer shapes.

    Weights stored as (in_features, out_features)."""
    if nlayers == 1:
        dims = [(ninput, noutput)]
    else:
        dims = [(ninput, nh)] + [(nh, nh)] * (nlayers - 2) + [(nh, noutput)]
    params = []
    for (fan_in, fan_out) in dims:
        kw, kb, key = jax.random.split(key, 3)
        bound = 1.0 / (fan_in ** 0.5)   # same scale as PyTorch Linear default
        w = jax.random.uniform(kw, (fan_in, fan_out), jnp.float32, -bound, bound)
        b = jax.random.uniform(kb, (fan_out,), jnp.float32, -bound, bound)
        params.append((w, b))
    return params


def mlp_reference(x, params, ninput, noutput, compute_dtype=jnp.bfloat16):
    """Pure-JAX reference using the same bf16-in / f32-accumulate recipe."""
    s = list(x.shape)
    s[-1] = noutput
    h = x.reshape(-1, ninput).astype(compute_dtype)
    for idx, (w, b) in enumerate(params):
        acc = jnp.dot(h, w.astype(compute_dtype),
                      preferred_element_type=jnp.float32) + b
        if idx < len(params) - 1:
            h = jnp.maximum(acc, 0.0).astype(compute_dtype)
        else:
            h = acc
    return h.reshape(*s)


if __name__ == "__main__":
    ninput, nh, noutput, nlayers = 32, 64, 16, 3
    batch, seq = 2, 8

    key = jax.random.PRNGKey(0)
    kx, kp = jax.random.split(key)
    x = jax.random.normal(kx, (batch, seq, ninput), jnp.float32)
    params = init_mlp_params(kp, ninput, nh, noutput, nlayers)

    out = mlp_forward(x, params, ninput, noutput)
    out = jax.block_until_ready(out)

    ref = mlp_reference(x, params, ninput, noutput)
    assert out.shape == (batch, seq, noutput), out.shape
    assert jnp.allclose(out, ref, atol=2e-2, rtol=2e-2), "mismatch vs reference"

    print("KERNEL_OK")
</pallas_src>

<mosaic_0001>
module attributes {stable_mosaic.version = 11 : i64} {
  func.func @_mlp_fused_kernel(%arg0: i32, %arg1: memref<16x32xbf16, #tpu.memory_space<vmem>>, %arg2: memref<32x64xbf16, #tpu.memory_space<vmem>>, %arg3: memref<1x64xf32, #tpu.memory_space<vmem>>, %arg4: memref<64x64xbf16, #tpu.memory_space<vmem>>, %arg5: memref<1x64xf32, #tpu.memory_space<vmem>>, %arg6: memref<64x16xbf16, #tpu.memory_space<vmem>>, %arg7: memref<1x16xf32, #tpu.memory_space<vmem>>, %arg8: memref<16x16xf32, #tpu.memory_space<vmem>>) attributes {dimension_semantics = [#tpu.dimension_semantics<parallel>], iteration_bounds = array<i64: 1>, scalar_prefetch = 0 : i64, scratch_operands = 0 : i64, tpu.core_type = #tpu.core_type<tc>, window_params = [{transform_indices = @transform_0, window_bounds = array<i64: 16, 32>}, {pipeline_mode = #tpu.pipeline_mode<synchronous>, transform_indices = @transform_1, window_bounds = array<i64: 32, 64>}, {pipeline_mode = #tpu.pipeline_mode<synchronous>, transform_indices = @transform_2, window_bounds = array<i64: 1, 64>}, {pipeline_mode = #tpu.pipeline_mode<synchronous>, transform_indices = @transform_3, window_bounds = array<i64: 64, 64>}, {pipeline_mode = #tpu.pipeline_mode<synchronous>, transform_indices = @transform_4, window_bounds = array<i64: 1, 64>}, {pipeline_mode = #tpu.pipeline_mode<synchronous>, transform_indices = @transform_5, window_bounds = array<i64: 64, 16>}, {pipeline_mode = #tpu.pipeline_mode<synchronous>, transform_indices = @transform_6, window_bounds = array<i64: 1, 16>}, {transform_indices = @transform_7, window_bounds = array<i64: 16, 16>}]} {
    %c0 = arith.constant 0 : index
    %c0_0 = arith.constant 0 : index
    %0 = vector.load %arg1[%c0, %c0_0] : memref<16x32xbf16, #tpu.memory_space<vmem>>, vector<16x32xbf16>
    %c0_1 = arith.constant 0 : index
    %c0_2 = arith.constant 0 : index
    %1 = vector.load %arg2[%c0_1, %c0_2] : memref<32x64xbf16, #tpu.memory_space<vmem>>, vector<32x64xbf16>
    %cst = arith.constant dense<0.000000e+00> : vector<16x64xf32>
    %2 = tpu.matmul %0, %1, %cst {dimension_numbers = #tpu.dot_dimension_numbers<[1], [0], [0], [1], [0, 0, 1, 1], [], []>} : vector<16x32xbf16>, vector<32x64xbf16>, vector<16x64xf32> -> vector<16x64xf32>
    %c0_3 = arith.constant 0 : index
    %c0_4 = arith.constant 0 : index
    %3 = vector.load %arg3[%c0_3, %c0_4] : memref<1x64xf32, #tpu.memory_space<vmem>>, vector<1x64xf32>
    %4 = vector.broadcast %3 : vector<1x64xf32> to vector<16x64xf32>
    %5 = arith.addf %2, %4 : vector<16x64xf32>
    %cst_5 = arith.constant 0.000000e+00 : f32
    %6 = vector.broadcast %cst_5 : f32 to vector<16x64xf32>
    %7 = arith.maximumf %5, %6 : vector<16x64xf32>
    %8 = arith.truncf %7 : vector<16x64xf32> to vector<16x64xbf16>
    %c0_6 = arith.constant 0 : index
    %c0_7 = arith.constant 0 : index
    %9 = vector.load %arg4[%c0_6, %c0_7] : memref<64x64xbf16, #tpu.memory_space<vmem>>, vector<64x64xbf16>
    %cst_8 = arith.constant dense<0.000000e+00> : vector<16x64xf32>
    %10 = tpu.matmul %8, %9, %cst_8 {dimension_numbers = #tpu.dot_dimension_numbers<[1], [0], [0], [1], [0, 0, 1, 1], [], []>} : vector<16x64xbf16>, vector<64x64xbf16>, vector<16x64xf32> -> vector<16x64xf32>
    %c0_9 = arith.constant 0 : index
    %c0_10 = arith.constant 0 : index
    %11 = vector.load %arg5[%c0_9, %c0_10] : memref<1x64xf32, #tpu.memory_space<vmem>>, vector<1x64xf32>
    %12 = vector.broadcast %11 : vector<1x64xf32> to vector<16x64xf32>
    %13 = arith.addf %10, %12 : vector<16x64xf32>
    %cst_11 = arith.constant 0.000000e+00 : f32
    %14 = vector.broadcast %cst_11 : f32 to vector<16x64xf32>
    %15 = arith.maximumf %13, %14 : vector<16x64xf32>
    %16 = arith.truncf %15 : vector<16x64xf32> to vector<16x64xbf16>
    %c0_12 = arith.constant 0 : index
    %c0_13 = arith.constant 0 : index
    %17 = vector.load %arg6[%c0_12, %c0_13] : memref<64x16xbf16, #tpu.memory_space<vmem>>, vector<64x16xbf16>
    %cst_14 = arith.constant dense<0.000000e+00> : vector<16x16xf32>
    %18 = tpu.matmul %16, %17, %cst_14 {dimension_numbers = #tpu.dot_dimension_numbers<[1], [0], [0], [1], [0, 0, 1, 1], [], []>} : vector<16x64xbf16>, vector<64x16xbf16>, vector<16x16xf32> -> vector<16x16xf32>
    %c0_15 = arith.constant 0 : index
    %c0_16 = arith.constant 0 : index
    %19 = vector.load %arg7[%c0_15, %c0_16] : memref<1x16xf32, #tpu.memory_space<vmem>>, vector<1x16xf32>
    %20 = vector.broadcast %19 : vector<1x16xf32> to vector<16x16xf32>
    %21 = arith.addf %18, %20 : vector<16x16xf32>
    %c0_17 = arith.constant 0 : index
    %c0_18 = arith.constant 0 : index
    %22 = vector.load %arg8[%c0_17, %c0_18] : memref<16x16xf32, #tpu.memory_space<vmem>>, vector<16x16xf32>
    tpu.vector_store %arg8[%c0_17, %c0_18], %21 {strides = array<i32>} : memref<16x16xf32, #tpu.memory_space<vmem>>, vector<16x16xf32>,
    return
  }
  func.func @transform_0(%arg0: i32) -> (i32, i32) {
    %c0_i32 = arith.constant 0 : i32
    %c0_i32_0 = arith.constant 0 : i32
    return %arg0, %c0_i32 : i32, i32
  }
  func.func @transform_1(%arg0: i32) -> (i32, i32) {
    %c0_i32 = arith.constant 0 : i32
    %c0_i32_0 = arith.constant 0 : i32
    %c0_i32_1 = arith.constant 0 : i32
    return %c0_i32, %c0_i32_0 : i32, i32
  }
  func.func @transform_2(%arg0: i32) -> (i32, i32) {
    %c0_i32 = arith.constant 0 : i32
    %c0_i32_0 = arith.constant 0 : i32
    %c0_i32_1 = arith.constant 0 : i32
    return %c0_i32, %c0_i32_0 : i32, i32
  }
  func.func @transform_3(%arg0: i32) -> (i32, i32) {
    %c0_i32 = arith.constant 0 : i32
    %c0_i32_0 = arith.constant 0 : i32
    %c0_i32_1 = arith.constant 0 : i32
    return %c0_i32, %c0_i32_0 : i32, i32
  }
  func.func @transform_4(%arg0: i32) -> (i32, i32) {
    %c0_i32 = arith.constant 0 : i32
    %c0_i32_0 = arith.constant 0 : i32
    %c0_i32_1 = arith.constant 0 : i32
    return %c0_i32, %c0_i32_0 : i32, i32
  }
  func.func @transform_5(%arg0: i32) -> (i32, i32) {
    %c0_i32 = arith.constant 0 : i32
    %c0_i32_0 = arith.constant 0 : i32
    %c0_i32_1 = arith.constant 0 : i32
    return %c0_i32, %c0_i32_0 : i32, i32
  }
  func.func @transform_6(%arg0: i32) -> (i32, i32) {
    %c0_i32 = arith.constant 0 : i32
    %c0_i32_0 = arith.constant 0 : i32
    %c0_i32_1 = arith.constant 0 : i32
    return %c0_i32, %c0_i32_0 : i32, i32
  }
  func.func @transform_7(%arg0: i32) -> (i32, i32) {
    %c0_i32 = arith.constant 0 : i32
    %c0_i32_0 = arith.constant 0 : i32
    return %arg0, %c0_i32 : i32, i32
  }
}

</mosaic_0001>

<bundles_post_ra>
// kernel: tpu_custom_call.1
= control target key start
LH: loop header
LB: loop body
LE: loop exit
PB: predicated region body
PF: predicated region fallthrough
CT: control target
= control target key end

     0   :  { %12 = vsyncpa [#allocation3], 0  ;;  %s555_s0 = inlined_call_operand.hbm [shape: bf16[16,32], index: 0, kind: input, shape index: {}]   ;;  %s556_s1 = inlined_call_operand.vmem [shape: bf16[32,64], index: 1, kind: input, shape index: {}]   ;;  %s557_s2 = inlined_call_operand.vmem [shape: f32[1,64], index: 2, kind: input, shape index: {}]   ;;  %s558_s3 = inlined_call_operand.vmem [shape: bf16[64,64], index: 3, kind: input, shape index: {}]   ;;  %s559_s4 = inlined_call_operand.vmem [shape: f32[1,64], index: 4, kind: input, shape index: {}]   ;;  %s560_s5 = inlined_call_operand.vmem [shape: bf16[64,16], index: 5, kind: input, shape index: {}]   ;;  %s561_s6 = inlined_call_operand.vmem [shape: f32[1,16], index: 6, kind: input, shape index: {}]   ;;  %s562_s7 = inlined_call_operand.hbm [shape: f32[16,16], index: 7, kind: output, shape index: {}]  }
   0x1   :  { %13 = vsyncpa [#allocation4], 0  ;;  %s439_s24 = smov [#allocation2]   ;;  %s391_s28 = scalar_lea.hbm %s555_s0, 128 }
   0x2   :  { %s19_s25 = sshll.u32 %s439_s24, 4  ;;  %p392_p0 = scmp.ne.s32.totalorder %s555_s0, %s391_s28  ;;  %s20_s25 = int_to_ptr.vmem [resolvable:$true] %s19_s25 }
   0x3   :  { %p395_p1 = scmp.lt.u32.totalorder %s391_s28, %s555_s0 }
   0x5   :  { %p397_p2 = pnand %p395_p1, %p392_p0 }
   0x7   :  { %400 = shalt.err (!%p397_p2)
}
   0x8   :  { %s401_s10 = scalar_lea.vmem %s20_s25, 128  ;;  %p406_p4 = scmp.lt.s32.totalorder %s20_s25, %s20_s25 }
   0x9   :  { %p402_p3 = scmp.ne.s32.totalorder %s20_s25, %s401_s10  ;;  %p407_p5 = scmp.lt.s32.totalorder %s401_s10, %s401_s10 }
   0xb   :  { %p408_p6 = por %p407_p5, %p406_p4 }
   0xd   :  { %p409_p7 = pnand %p408_p6, %p402_p3 }
   0xf   :  { %412 = shalt.err (!%p409_p7)
}
  0x10   :  { %s440_s11 = smov 64   ;;  %s441_s12 = smov 4  }
  0x11   :  { %25 = dma.hbm_to_vmem [thread:$0]  %s555_s0, 128, %s20_s25, [#allocation3], %s440_s11, %s440_s11, %s441_s12  }
  0x12   :  { %435 = dma.done.wait [#allocation3], 128  }
  0x13   :  { %436 = vsyncadd [#allocation3], 4294967168  ;;  %v442_v0 = vmov 0.0   ;;  %vm443_vm0 = vmmov 0   ;;  %v380_v1 = vld [vmem:[%s556_s1] sm:$0xff]   ;;  %v381_v2 = vld [vmem:[%s556_s1 + $0x8] sm:$0xff]  }
  0x14   :  { %340 = vmatprep.subr.bf16.mxu0 %v442_v0  ;;  %344 = vmatprep.mubr.msk.bf16.mxu0 %vm443_vm0, %v442_v0  ;;  %v383_v3 = vld [vmem:[%s558_s3] sm:$0xff]   ;;  %vm72_vm1 = vcmask 261120   ;;  %v384_v5 = vld [vmem:[%s558_s3 + $0x8] sm:$0xff]   ;;  %v385_v6 = vld [vmem:[%s558_s3 + $0x10] sm:$0xff]   ;;  %vm159_vm2 = vcmask 523264   ;;  %vm290_vm3 = vcmask 130048  }
  0x15   :  { %348 = vmatprep.subr.bf16.mxu1 %v442_v0  ;;  %356 = vmatprep.mubr.msk.bf16.mxu1 %vm443_vm0, %v442_v0  ;;  %v382_v4 = vld [vmem:[#allocation2] sm:$0xff]   ;;  %v386_v7 = vld [vmem:[%s558_s3 + $0x18] sm:$0xff]   ;;  %v388_v9 = vld [vmem:[%s560_s5 + $0x8] sm:$0xff]  }
  0x16   :  { %341 = vmatpush3.bf16.msra.mxu0 %v380_v1  ;;  %349 = vmatpush3.bf16.msra.mxu1 %v383_v3  ;;  %v387_v8 = vld [vmem:[%s560_s5] sm:$0xff]   ;;  %v389_v20 = vld [vmem:[%s560_s5 + $0x10] sm:$0xff]   ;;  %v390_v21 = vld [vmem:[%s560_s5 + $0x18] sm:$0xff]   ;;  %s444_s5 = smov [#allocation5]  }
  0x17   :  { %342 = vmatprep.subr.bf16.mxu0 %v442_v0  ;;  %350 = vmatprep.subr.bf16.mxu1 %v442_v0  ;;  %v310_v10 = vld [vmem:[%s557_s2] ss:$0 sm:$0xff]  ;;  %s298_s14 = sshll.u32 %s444_s5, 4  ;;  %s299_s14 = int_to_ptr.vmem [resolvable:$true] %s298_s14 }
  0x18   :  { %v315_v22 = vld [vmem:[%s559_s4] ss:$0 sm:$0xff]  ;;  %s413_s4 = scalar_lea.vmem %s299_s14, 256  ;;  %p418_p9 = scmp.lt.s32.totalorder %s299_s14, %s299_s14 }
  0x19   :  { %v321_v32 = vld [vmem:[%s561_s6] ss:$0 sm:$0xff]  ;;  %p414_p8 = scmp.ne.s32.totalorder %s299_s14, %s413_s4  ;;  %p419_p10 = scmp.lt.s32.totalorder %s413_s4, %s413_s4 }
  0x1a   :  { %343 = vmatpush3.bf16.msra.mxu0 %v381_v2  ;;  %351 = vmatpush3.bf16.msra.mxu1 %v384_v5 }
  0x1b   :  { %360 = vmatprep.subr.bf16.mxu0 %v442_v0  ;;  %352 = vmatprep.subr.bf16.mxu1 %v442_v0  ;;  %p420_p11 = por %p419_p10, %p418_p9 }
  0x1d   :  { %345 = vmatmul.mubr.msk.bf16.vlgmr.msra.gmra.mrb[0].mxu0 %vm72_vm1, %v382_v4  ;;  %p421_p12 = pnand %p420_p11, %p414_p8 }
  0x1e   :  { %368 = vmatprep.mubr.msk.bf16.mxu0 %vm443_vm0, %v442_v0  ;;  %353 = vmatpush3.bf16.msra.mxu1 %v385_v6 }
  0x1f   :  { %354 = vmatprep.subr.bf16.mxu1 %v442_v0  ;;  %361 = vmatpush3.bf16.msra.mxu0 %v387_v8 }
  0x20   :  { %362 = vmatprep.subr.bf16.mxu0 %v442_v0 }
  0x22   :  { %355 = vmatpush3.bf16.msra.mxu1 %v386_v7 }
  0x23   :  { %363 = vmatpush3.bf16.msra.mxu0 %v388_v9 }
  0x24   :  { %364 = vmatprep.subr.bf16.mxu0 %v442_v0 }
  0x27   :  { %365 = vmatpush3.bf16.msra.mxu0 %v389_v20 }
  0x28   :  { %366 = vmatprep.subr.bf16.mxu0 %v442_v0 }
  0x2b   :  { %367 = vmatpush3.bf16.msra.mxu0 %v390_v21 }
  0xf0   :  { %v110_v11 = vpop.f32.mrb[0].mxu0 }
  0xf1   :  { %v111_v12 = vadd.f32 %v310_v10, %v110_v11  ;;  %v346_v13 = vpop.f32.mrb[1].mxu0 }
  0xf2   :  { %v113_v14 = vpop.f32.mrb[2].mxu0 }
  0xf3   :  { %v114_v15 = vadd.f32 %v310_v10, %v113_v14  ;;  %v347_v16 = vpop.f32.mrb[3].mxu0  ;;  %v117_v17 = vmax.f32 %v111_v12, 0.0 }
  0xf5   :  { %v118_v18 = vmax.f32 %v114_v15, 0.0 }
  0xf7   :  { %v119_v19 = vpack.c.bf16 %v118_v18, %v117_v17 }
  0xf9   :  { %357 = vmatmul.mubr.msk.bf16.vlgmr.msra.gmra.mrb[0].mxu1 %vm159_vm2, %v119_v19 }
 0x1cc   :  { %v197_v23 = vpop.f32.mrb[0].mxu1 }
 0x1cd   :  { %v198_v24 = vadd.f32 %v315_v22, %v197_v23  ;;  %v358_v25 = vpop.f32.mrb[1].mxu1 }
 0x1ce   :  { %v200_v26 = vpop.f32.mrb[2].mxu1 }
 0x1cf   :  { %v201_v27 = vadd.f32 %v315_v22, %v200_v26  ;;  %v359_v28 = vpop.f32.mrb[3].mxu1  ;;  %v204_v29 = vmax.f32 %v198_v24, 0.0 }
 0x1d1   :  { %v205_v30 = vmax.f32 %v201_v27, 0.0 }
 0x1d3   :  { %v206_v31 = vpack.c.bf16 %v205_v30, %v204_v29 }
 0x1d5   :  { %369 = vmatmul.mubr.msk.bf16.vlgmr.msra.gmra.mrb[4].mxu0 %vm159_vm2, %v206_v31 }
 0x2a8   :  { %v283_v33 = vpop.f32.mrb[4].mxu0 }
 0x2a9   :  { %v284_v34 = vadd.f32 %v321_v32, %v283_v33  ;;  %v370_v35 = vpop.f32.mrb[5].mxu0 }
 0x2aa   :  { %v286_v36 = vpop.f32.mrb[6].mxu0 }
 0x2ab   :  { %291 = vst.msk [vmem:[#allocation5] sm:$0xff] %vm290_vm3, %v284_v34  ;;  %v287_v37 = vadd.f32 %v321_v32, %v286_v36  ;;  %v371_v38 = vpop.f32.mrb[7].mxu0 }
 0x2ad   :  { %292 = vst.msk [vmem:[#allocation5 + $0x8] sm:$0xff] %vm290_vm3, %v287_v37 }
 0x2ae   :  { %424 = shalt.err (!%p421_p12)
}
 0x2af   :  { %s425_s16 = scalar_lea.hbm %s562_s7, 256 }
 0x2b0   :  { %p426_p13 = scmp.ne.s32.totalorder %s562_s7, %s425_s16  ;;  %p429_p0 = scmp.lt.u32.totalorder %s425_s16, %s562_s7 }
 0x2b2   :  { %p431_p1 = pnand %p429_p0, %p426_p13 }
 0x2b4   :  { %434 = shalt.err (!%p431_p1)
}
 0x2b5   :  { %s445_s20 = smov 128   ;;  %s446_s21 = smov 8  }
 0x2b6   :  { %304 = dma.vmem_to_hbm [thread:$0]  %s299_s14, 256, %s562_s7, [#allocation4], %s445_s20, %s445_s20, %s446_s21  }
 0x2b7   :  { %437 = dma.done.wait [#allocation4], 256  }
 0x2b8   :  { %438 = vsyncadd [#allocation4], 4294967040 }
 0x2b9   :  { %308 = vsyncpa [#allocation3], 1 }
 0x2ba   :  { %309 = vsyncpa [#allocation4], 1 }

</bundles_post_ra>
